<compile_context>
chip_gen: v6e
topology: v6e:2x2x1
jax: 0.10.0
libtpu: 0.0.40
codegen_flags: <defaults>
</compile_context>

<pallas_src>
import jax
import jax.numpy as jnp
from jax.experimental import pallas as pl
from jax.experimental.pallas import tpu as pltpu


def compose_kernel(x_ref, mask_ref, o_ref):
    # Fused sequential application of (NodeDrop ∘ NodeFeatureMasking): the
    # combined 0/1 keep-mask is the product of both transforms' masks.
    # int8 -> float cast rides the VPU, which has huge slack in this
    # HBM-streaming kernel.
    o_ref[...] = x_ref[...] * mask_ref[...].astype(x_ref.dtype)


def _round_up(v, m):
    return ((v + m - 1) // m) * m


def _tpu_budgets():
    """Returns (block_vmem_budget_bytes, scoped_vmem_limit_bytes, num_tcs)."""
    try:
        vmem = getattr(pltpu.get_tpu_info(), "vmem_capacity_bytes", None)
    except Exception:
        vmem = None
    if vmem is not None and vmem <= 64 * 1024 * 1024:
        # v7x-class chip: 64 MiB physical VMEM, 2 TensorCores per chip.
        return 20 << 20, 32 << 20, 2
    # v5e / v6e class (or unknown): 128 MiB physical VMEM, 1 TensorCore.
    return 40 << 20, 64 << 20, 1


def _choose_block_rows(R, L, itemsize, block_budget, num_tcs):
    """Row block for an (R, L) slab: multiple of 32 (int8 mask tile), sized to
    the per-generation VMEM budget, with a v7x-only >=2-grid-step cap."""
    total_bytes = R * L * (2 * itemsize + 1)
    if total_bytes <= (1 << 20):
        # Tiny problem: per-grid-step overhead dominates; one resident block.
        return R
    # Per-row pipelined footprint: x + out (itemsize each) + int8 mask, each
    # double-buffered by the BlockSpec pipeline.
    per_row = (2 * itemsize + 1) * L * 2
    rows = max(32, (block_budget // per_row) // 32 * 32)
    if num_tcs > 1 and R > 64:
        # v7x only: keep (ideally exactly) 2 grid steps so both TensorCores
        # get an equal share under dimension_semantics=("parallel",).
        rows = min(rows, _round_up(pl.cdiv(R, 2), 32))
    if rows >= R:
        return R  # whole slab in one block (block == full extent is legal)
    return rows


def compose_forward(x, keep_mask, *, block_rows=None):
    """Apply the composed (NodeDrop ∘ NodeFeatureMasking) transforms.

    x:          [N, D] float features.
    keep_mask:  [N, D] int8 combined 0/1 keep mask (node mask folded in).

    The output does NOT alias x.  If in-place semantics are desired, jit this
    wrapper with donate_argnums=(0,) and add input_output_aliases={0: 0};
    without donation XLA inserts a defensive copy that costs more HBM traffic
    than the alias saves.
    """
    N, D = x.shape
    assert keep_mask.shape == (N, D)
    itemsize = jnp.dtype(x.dtype).itemsize
    total = N * D

    # Lane-dense flattening: the op is elementwise, so present it to the TPU
    # as an (R, L) slab with the largest lane width (multiple of 128) that
    # evenly divides the element count.  Row-major reshape is free in HBM.
    L = None
    for cand in (4096, 2048, 1024, 512, 256, 128):
        if total % cand == 0:
            L = cand
            break
    if L is not None:
        R = total // L
        x2 = x.reshape(R, L)
        m2 = keep_mask.reshape(R, L)
    else:
        # Fallback: keep (N, D); the lane block spans the full D extent
        # (legal for any D), rows are tiled with a cdiv grid.
        R, L = N, D
        x2, m2 = x, keep_mask

    block_budget, vmem_limit, num_tcs = _tpu_budgets()
    if block_rows is None:
        block_rows = _choose_block_rows(R, L, itemsize, block_budget, num_tcs)
    block_rows = min(block_rows, R)
    grid = (pl.cdiv(R, block_rows),)  # ragged last block is masked by Pallas

    out2 = pl.pallas_call(
        compose_kernel,
        out_shape=jax.ShapeDtypeStruct((R, L), x.dtype),
        grid_spec=pltpu.PrefetchScalarGridSpec(
            num_scalar_prefetch=0,
            grid=grid,
            in_specs=[
                pl.BlockSpec((block_rows, L), lambda i: (i, 0)),  # x slab
                pl.BlockSpec((block_rows, L), lambda i: (i, 0)),  # int8 mask
            ],
            out_specs=pl.BlockSpec((block_rows, L), lambda i: (i, 0)),
        ),
        compiler_params=pltpu.CompilerParams(
            dimension_semantics=("parallel",),
            vmem_limit_bytes=vmem_limit,
        ),
    )(x2, m2)
    return out2.reshape(N, D)


def _run_case(key, N, D, p_node_drop, p_feat_mask):
    k_x, k_node, k_feat = jax.random.split(key, 3)
    x = jax.random.normal(k_x, (N, D), dtype=jnp.float32)

    # Deterministic "augmentation parameters" (the transforms' state).
    node_keep = (jax.random.uniform(k_node, (N, 1)) >= p_node_drop)
    feat_keep = (jax.random.uniform(k_feat, (N, D)) >= p_feat_mask)

    # Fold NodeDrop's row mask into the feature mask; store as int8 to shrink
    # the HBM mask stream.
    combined_mask = (node_keep & feat_keep).astype(jnp.int8)

    # Reference: sequential application, exactly as Compose.forward does.
    ref = x
    ref = ref * node_keep.astype(jnp.float32)   # NodeDrop
    ref = ref * feat_keep.astype(jnp.float32)   # NodeFeatureMasking

    out = compose_forward(x, combined_mask)
    out = jax.block_until_ready(out)

    assert out.shape == (N, D) and out.dtype == x.dtype
    assert jnp.allclose(out, ref, atol=0.0, rtol=0.0), "mismatch vs reference"


if __name__ == "__main__":
    key = jax.random.PRNGKey(0)
    k1, k2 = jax.random.split(key)

    # Small graph: 64 nodes, 128-dim features (lane-dense flattened path).
    _run_case(k1, N=64, D=128, p_node_drop=0.10, p_feat_mask=0.15)

    # Awkward node count (not a multiple of 8) — exercises the cdiv/no-divisor
    # robustness path.
    _run_case(k2, N=50, D=128, p_node_drop=0.20, p_feat_mask=0.10)

    print("KERNEL_OK")
</pallas_src>

<mosaic_0001>
module attributes {stable_mosaic.version = 11 : i64} {
  func.func @compose_kernel(%arg0: i32, %arg1: memref<2x4096xf32, #tpu.memory_space<vmem>>, %arg2: memref<2x4096xi8, #tpu.memory_space<vmem>>, %arg3: memref<2x4096xf32, #tpu.memory_space<vmem>>) attributes {dimension_semantics = [#tpu.dimension_semantics<parallel>], iteration_bounds = array<i64: 1>, scalar_prefetch = 0 : i64, scratch_operands = 0 : i64, tpu.core_type = #tpu.core_type<tc>, window_params = [{transform_indices = @transform_0, window_bounds = array<i64: 2, 4096>}, {transform_indices = @transform_1, window_bounds = array<i64: 2, 4096>}, {transform_indices = @transform_2, window_bounds = array<i64: 2, 4096>}]} {
    %c0 = arith.constant 0 : index
    %c0_0 = arith.constant 0 : index
    %0 = vector.load %arg1[%c0, %c0_0] : memref<2x4096xf32, #tpu.memory_space<vmem>>, vector<2x4096xf32>
    %c0_1 = arith.constant 0 : index
    %c0_2 = arith.constant 0 : index
    %1 = vector.load %arg2[%c0_1, %c0_2] : memref<2x4096xi8, #tpu.memory_space<vmem>>, vector<2x4096xi8>
    %2 = arith.sitofp %1 : vector<2x4096xi8> to vector<2x4096xf32>
    %3 = arith.mulf %0, %2 : vector<2x4096xf32>
    %c0_3 = arith.constant 0 : index
    %c0_4 = arith.constant 0 : index
    %4 = vector.load %arg3[%c0_3, %c0_4] : memref<2x4096xf32, #tpu.memory_space<vmem>>, vector<2x4096xf32>
    tpu.vector_store %arg3[%c0_3, %c0_4], %3 {strides = array<i32>} : memref<2x4096xf32, #tpu.memory_space<vmem>>, vector<2x4096xf32>,
    return
  }
  func.func @transform_0(%arg0: i32) -> (i32, i32) {
    %c0_i32 = arith.constant 0 : i32
    %c0_i32_0 = arith.constant 0 : i32
    return %arg0, %c0_i32 : i32, i32
  }
  func.func @transform_1(%arg0: i32) -> (i32, i32) {
    %c0_i32 = arith.constant 0 : i32
    %c0_i32_0 = arith.constant 0 : i32
    return %arg0, %c0_i32 : i32, i32
  }
  func.func @transform_2(%arg0: i32) -> (i32, i32) {
    %c0_i32 = arith.constant 0 : i32
    %c0_i32_0 = arith.constant 0 : i32
    return %arg0, %c0_i32 : i32, i32
  }
}

</mosaic_0001>

<bundles_post_ra>
// kernel: tpu_custom_call.1
= control target key start
LH: loop header
LB: loop body
LE: loop exit
PB: predicated region body
PF: predicated region fallthrough
CT: control target
= control target key end

     0   :  { %7 = vsyncpa [#allocation3], 0  ;;  %s372_s0 = inlined_call_operand.hbm [shape: f32[2,4096], index: 0, kind: input, shape index: {}]   ;;  %s373_s1 = inlined_call_operand.hbm [shape: s8[2,4096], index: 1, kind: input, shape index: {}]   ;;  %s374_s2 = inlined_call_operand.hbm [shape: f32[2,4096], index: 2, kind: output, shape index: {}]  }
   0x1   :  { %8 = vsyncpa [#allocation6], 0 }
   0x2   :  { %9 = vsyncpa [#allocation4], 0  ;;  %s326_s9 = smov [#allocation2]   ;;  %s327_s11 = smov [#allocation5]  }
   0x3   :  { %s16_s10 = sshll.u32 %s326_s9, 4  ;;  %s26_s12 = sshll.u32 %s327_s11, 4  ;;  %s17_s10 = int_to_ptr.vmem [resolvable:$true] %s16_s10  ;;  %s27_s12 = int_to_ptr.vmem [resolvable:$true] %s26_s12 }
   0x4   :  { %s268_s13 = scalar_lea.vmem %s17_s10, 1024  ;;  %p273_p1 = scmp.lt.s32.totalorder %s17_s10, %s17_s10 }
   0x5   :  { %p269_p0 = scmp.ne.s32.totalorder %s17_s10, %s268_s13  ;;  %p274_p2 = scmp.lt.s32.totalorder %s268_s13, %s268_s13 }
   0x7   :  { %p275_p3 = por %p274_p2, %p273_p1 }
   0x9   :  { %p276_p4 = pnand %p275_p3, %p269_p0 }
   0xb   :  { %279 = shalt.err (!%p276_p4)
}
   0xc   :  { %19 = dma.hbm_to_vmem [thread:$0]  %s372_s0, 1024, %s17_s10, [#allocation3]  }
   0xd   :  { %s288_s16 = scalar_lea.vmem %s27_s12, 512  ;;  %p293_p6 = scmp.lt.s32.totalorder %s27_s12, %s27_s12 }
   0xe   :  { %p289_p5 = scmp.ne.s32.totalorder %s27_s12, %s288_s16  ;;  %p294_p7 = scmp.lt.s32.totalorder %s288_s16, %s288_s16 }
  0x10   :  { %p295_p8 = por %p294_p7, %p293_p6 }
  0x12   :  { %p296_p9 = pnand %p295_p8, %p289_p5 }
  0x14   :  { %299 = shalt.err (!%p296_p9)
}
  0x15   :  { %29 = dma.hbm_to_vmem [thread:$0]  %s373_s1, 512, %s27_s12, [#allocation6]  }
  0x16   :  { %320 = dma.done.wait [#allocation3], 1024  }
  0x17   :  { %321 = vsyncadd [#allocation3], 4294966272 }
  0x18   :  { %322 = dma.done.wait [#allocation6], 512  }
  0x19   :  { %323 = vsyncadd [#allocation6], 4294966784  ;;  %v99_v0 = vlaneseq  ;;  %v328_v1 = vmov 1983009808   ;;  %v44_v5 = vld [vmem:[#allocation5] sm:$0xff]  ;;  %v45_v11 = vld [vmem:[#allocation5 + $0x8] sm:$0xff] }
  0x1a   :  { %v97_v2 = vunpack.c.l.s4 %v328_v1  ;;  %v48_v7 = vunpack.c.0.s8 %v44_v5  ;;  %v49_v8 = vunpack.c.1.s8 %v44_v5  ;;  %v50_v9 = vunpack.c.2.s8 %v44_v5  ;;  %v46_v24 = vld [vmem:[#allocation5 + $0x10] sm:$0xff]  ;;  %v36_v29 = vld [vmem:[#allocation2] sm:$0xff]  ;;  %v37_v30 = vld [vmem:[#allocation2 + $0x8] sm:$0xff]  ;;  %s329_s0 = smov [#allocation7]  }
  0x1b   :  { %v100_v4 = vshrl.u32 %v99_v0, 7  ;;  %v51_v10 = vunpack.c.3.s8 %v44_v5  ;;  %v52_v12 = vunpack.c.0.s8 %v45_v11  ;;  %v53_v13 = vunpack.c.1.s8 %v45_v11  ;;  %v38_v37 = vld [vmem:[#allocation2 + $0x10] sm:$0xff]  ;;  %v39_v38 = vld [vmem:[#allocation2 + $0x18] sm:$0xff]  ;;  %v40_v58 = vld [vmem:[#allocation2 + $0x20] sm:$0xff]  ;;  %s246_s1 = sshll.u32 %s329_s0, 4  ;;  %s247_s1 = int_to_ptr.vmem [resolvable:$true] %s246_s1 }
  0x1c   :  { %v98_v3 = vunpack.c.0.s8 %v97_v2  ;;  %v54_v14 = vunpack.c.2.s8 %v45_v11  ;;  %v55_v15 = vunpack.c.3.s8 %v45_v11  ;;  %v64_v16 = vcvt.s32.f32 %v48_v7  ;;  %v47_v45 = vld [vmem:[#allocation5 + $0x18] sm:$0xff]  ;;  %v41_v0 = vld [vmem:[#allocation2 + $0x28] sm:$0xff]  ;;  %v42_v11 = vld [vmem:[#allocation2 + $0x30] sm:$0xff]  ;;  %s300_s19 = scalar_lea.vmem %s247_s1, 1024  ;;  %p305_p11 = scmp.lt.s32.totalorder %s247_s1, %s247_s1 }
  0x1d   :  { %v65_v17 = vcvt.s32.f32 %v49_v8  ;;  %v66_v18 = vcvt.s32.f32 %v50_v9  ;;  %v67_v19 = vcvt.s32.f32 %v51_v10  ;;  %v68_v20 = vcvt.s32.f32 %v52_v12  ;;  %p301_p10 = scmp.ne.s32.totalorder %s247_s1, %s300_s19  ;;  %p306_p12 = scmp.lt.s32.totalorder %s300_s19, %s300_s19 }
  0x1e   :  { %v351_v6 = vsub.s32 %v98_v3, %v100_v4  ;;  %v69_v21 = vcvt.s32.f32 %v53_v13  ;;  %v70_v22 = vcvt.s32.f32 %v54_v14  ;;  %v71_v23 = vcvt.s32.f32 %v55_v15  ;;  %v43_v15 = vld [vmem:[#allocation2 + $0x38] sm:$0xff] }
  0x1f   :  { %v56_v39 = vunpack.c.0.s8 %v46_v24  ;;  %v57_v40 = vunpack.c.1.s8 %v46_v24  ;;  %v58_v43 = vunpack.c.2.s8 %v46_v24  ;;  %v59_v44 = vunpack.c.3.s8 %v46_v24  ;;  %p307_p13 = por %p306_p12, %p305_p11 }
  0x20   :  { %v102_v25 = vrot.slane %v64_v16, %v351_v6  ;;  %v109_v26 = vrot.slane %v65_v17, %v351_v6  ;;  %v117_v27 = vrot.slane %v66_v18, %v351_v6  ;;  %v124_v28 = vrot.slane %v67_v19, %v351_v6 }
  0x21   :  { %v132_v31 = vrot.slane %v68_v20, %v351_v6  ;;  %v139_v32 = vrot.slane %v69_v21, %v351_v6  ;;  %v147_v33 = vrot.slane %v70_v22, %v351_v6  ;;  %v154_v34 = vrot.slane %v71_v23, %v351_v6  ;;  %p308_p0 = pnand %p307_p13, %p301_p10 }
  0x22   :  { %v110_v35 = vcombine.low %v102_v25, %v109_v26  ;;  %v125_v36 = vcombine.low %v117_v27, %v124_v28  ;;  %v72_v48 = vcvt.s32.f32 %v56_v39  ;;  %v73_v49 = vcvt.s32.f32 %v57_v40 }
  0x23   :  { %v140_v41 = vcombine.low %v132_v31, %v139_v32  ;;  %v155_v42 = vcombine.low %v147_v33, %v154_v34  ;;  %v74_v52 = vcvt.s32.f32 %v58_v43  ;;  %v75_v53 = vcvt.s32.f32 %v59_v44 }
  0x24   :  { %v224_v46 = vmul.f32 %v110_v35, %v36_v29  ;;  %v225_v47 = vmul.f32 %v125_v36, %v37_v30  ;;  %v162_v54 = vrot.slane %v72_v48, %v351_v6  ;;  %v169_v55 = vrot.slane %v73_v49, %v351_v6 }
  0x25   :  { %v226_v50 = vmul.f32 %v140_v41, %v38_v37  ;;  %v227_v51 = vmul.f32 %v155_v42, %v39_v38  ;;  %v60_v56 = vunpack.c.0.s8 %v47_v45  ;;  %v61_v57 = vunpack.c.1.s8 %v47_v45 }
  0x26   :  { %232 = vst [vmem:[#allocation7] sm:$0xff] %v224_v46  ;;  %233 = vst [vmem:[#allocation7 + $0x8] sm:$0xff] %v225_v47  ;;  %v177_v59 = vrot.slane %v74_v52, %v351_v6  ;;  %v184_v60 = vrot.slane %v75_v53, %v351_v6  ;;  %v62_v61 = vunpack.c.2.s8 %v47_v45  ;;  %v63_v62 = vunpack.c.3.s8 %v47_v45 }
  0x27   :  { %234 = vst [vmem:[#allocation7 + $0x10] sm:$0xff] %v226_v50  ;;  %235 = vst [vmem:[#allocation7 + $0x18] sm:$0xff] %v227_v51  ;;  %v170_v63 = vcombine.low %v162_v54, %v169_v55  ;;  %v76_v1 = vcvt.s32.f32 %v60_v56  ;;  %v77_v2 = vcvt.s32.f32 %v61_v57 }
  0x28   :  { %v185_v3 = vcombine.low %v177_v59, %v184_v60  ;;  %v78_v4 = vcvt.s32.f32 %v62_v61  ;;  %v79_v5 = vcvt.s32.f32 %v63_v62 }
  0x29   :  { %v228_v7 = vmul.f32 %v170_v63, %v40_v58  ;;  %v192_v8 = vrot.slane %v76_v1, %v351_v6  ;;  %v199_v9 = vrot.slane %v77_v2, %v351_v6 }
  0x2a   :  { %v229_v10 = vmul.f32 %v185_v3, %v41_v0  ;;  %v207_v12 = vrot.slane %v78_v4, %v351_v6  ;;  %v214_v13 = vrot.slane %v79_v5, %v351_v6 }
  0x2b   :  { %236 = vst [vmem:[#allocation7 + $0x20] sm:$0xff] %v228_v7  ;;  %v200_v14 = vcombine.low %v192_v8, %v199_v9 }
  0x2c   :  { %237 = vst [vmem:[#allocation7 + $0x28] sm:$0xff] %v229_v10  ;;  %v215_v16 = vcombine.low %v207_v12, %v214_v13 }
  0x2d   :  { %v230_v17 = vmul.f32 %v200_v14, %v42_v11 }
  0x2e   :  { %v231_v18 = vmul.f32 %v215_v16, %v43_v15 }
  0x2f   :  { %238 = vst [vmem:[#allocation7 + $0x30] sm:$0xff] %v230_v17 }
  0x30   :  { %239 = vst [vmem:[#allocation7 + $0x38] sm:$0xff] %v231_v18 }
  0x31   :  { %311 = shalt.err (!%p308_p0)
}
  0x32   :  { %249 = dma.vmem_to_hbm [thread:$0]  %s247_s1, 1024, %s374_s2, [#allocation4]  }
  0x33   :  { %324 = dma.done.wait [#allocation4], 1024  }
  0x34   :  { %325 = vsyncadd [#allocation4], 4294966272 }
  0x35   :  { %253 = vsyncpa [#allocation3], 1 }
  0x36   :  { %254 = vsyncpa [#allocation6], 1 }
  0x37   :  { %255 = vsyncpa [#allocation4], 1 }

</bundles_post_ra>
